<compile_context>
chip_gen: v7x
topology: tpu7x:2x2x1
jax: 0.10.0
libtpu: 0.0.40
codegen_flags: <defaults>
</compile_context>

<pallas_src>
import functools

import jax
import jax.numpy as jnp
from jax.experimental import pallas as pl
from jax.experimental.pallas import tpu as pltpu

_LANE = 128      # lane width of a vreg
_SUBLANE = 8     # sublane count of a vreg


def _round_up(n, m):
    return ((n + m - 1) // m) * m


def _mlp_kernel(num_layers, *refs):
    """Fused MLP forward on one batch tile.

    refs = (x_ref, W1, b1, W2, b2, ..., WL, bL, out_ref)
    tanh after every layer except the last.  All feature dims are padded to
    128-lane multiples by the wrapper, so all matmuls/stores are full-lane.
    """
    x_ref = refs[0]
    out_ref = refs[-1]
    param_refs = refs[1:-1]

    h = x_ref[...]  # native dtype straight into the MXU
    for layer in range(num_layers):
        w_ref = param_refs[2 * layer]
        b_ref = param_refs[2 * layer + 1]
        # MXU matmul in native operand dtype, f32 accumulate.
        acc = jnp.dot(h, w_ref[...], preferred_element_type=jnp.float32)
        acc = acc + b_ref[...].astype(jnp.float32)  # (1, Dout) broadcast over rows
        if layer < num_layers - 1:
            acc = jnp.tanh(acc)                 # EUP, f32 (v5e-safe)
            h = acc.astype(w_ref.dtype)         # next matmul in weight dtype
        else:
            h = acc
    out_ref[...] = h.astype(out_ref.dtype)


def ode_func_forward(t, x, params, *, batch_tile=512):
    """Pallas implementation of ODEFunc.forward(t, x) = MLP(x). `t` is unused."""
    del t  # ODEFunc ignores t, matching the PyTorch module.
    num_layers = len(params)
    B, in_dim = x.shape
    del in_dim
    out_dim = params[-1][0].shape[1]
    out_dtype = x.dtype
    itemsize = jnp.dtype(x.dtype).itemsize

    # Layer-boundary widths and their 128-lane padded versions.
    dims = [params[0][0].shape[0]] + [w.shape[1] for (w, _) in params]
    padded = [_round_up(d, _LANE) for d in dims]

    # Batch tiling: tile is a multiple of 8 sublanes; batch padded to a tile
    # multiple; one grid axis, marked "parallel".
    tb = _round_up(min(batch_tile, _round_up(B, _SUBLANE)), _SUBLANE)
    b_pad = _round_up(B, tb)
    grid = (b_pad // tb,)

    # Zero-pad input (rows to b_pad, features to padded[0]).  Exact: padded
    # lanes/rows are zero and get sliced off at the end.
    x_p = jnp.pad(x, ((0, b_pad - B), (0, padded[0] - dims[0])))

    flat_args = [x_p]
    in_specs = [pl.BlockSpec((tb, padded[0]), lambda i: (i, 0))]
    for li, (w, b) in enumerate(params):
        din, dout = w.shape
        w_p = jnp.pad(w, ((0, padded[li] - din), (0, padded[li + 1] - dout)))
        b_p = jnp.pad(b.reshape(1, -1), ((0, 0), (0, padded[li + 1] - dout)))
        flat_args.append(w_p)
        flat_args.append(b_p)
        # index_map ignores the grid index -> params stay VMEM-resident
        # across batch tiles (fetched once).
        in_specs.append(pl.BlockSpec(w_p.shape, lambda i: (0, 0)))
        in_specs.append(pl.BlockSpec(b_p.shape, lambda i: (0, 0)))

    # Advisory cost estimate (helps XLA schedule surrounding solver ops).
    flops = 2 * b_pad * sum(padded[i] * padded[i + 1] for i in range(num_layers))
    transcendentals = b_pad * sum(padded[1:-1])  # tanh on all hidden layers
    param_bytes = sum(int(a.size) * a.dtype.itemsize for a in flat_args[1:])
    bytes_accessed = (int(x_p.size) * itemsize + param_bytes
                      + b_pad * padded[-1] * itemsize)
    cost = pl.CostEstimate(flops=flops, transcendentals=transcendentals,
                           bytes_accessed=bytes_accessed)

    # VMEM budget: resident params + double-buffered x/out tiles + f32
    # activation scratch.  Clamp to 64 MiB so the same config fits v7x.
    io_bytes = 2 * tb * (padded[0] + padded[-1]) * itemsize
    act_bytes = 4 * tb * max(padded) * 4
    vmem_needed = param_bytes + io_bytes + act_bytes
    vmem_limit = int(min(max(2 * vmem_needed, 8 << 20), 64 << 20))

    kernel = functools.partial(_mlp_kernel, num_layers)

    y = pl.pallas_call(
        kernel,
        out_shape=jax.ShapeDtypeStruct((b_pad, padded[-1]), out_dtype),
        grid=grid,
        in_specs=in_specs,
        out_specs=pl.BlockSpec((tb, padded[-1]), lambda i: (i, 0)),
        compiler_params=pltpu.CompilerParams(
            dimension_semantics=("parallel",),
            vmem_limit_bytes=vmem_limit,
        ),
        cost_estimate=cost,
    )(*flat_args)

    return y[:B, :out_dim]


def init_ode_func_params(key, input_dim, hidden_dim, num_layers,
                         dtype=jnp.float32):
    """Deterministic params matching ODEFunc.__init__ shapes.

    MLP(input_dim, input_dim, hidden_dim, num_layers):
      Linear(input_dim, hidden_dim), [Linear(hidden_dim, hidden_dim)]*(L-2),
      Linear(hidden_dim, input_dim).
    Returns list of (W, b) with W shaped (in, out).
    """
    dims = [input_dim] + [hidden_dim] * (num_layers - 1) + [input_dim]
    params = []
    for i in range(num_layers):
        fan_in, fan_out = dims[i], dims[i + 1]
        key, kw, kb = jax.random.split(key, 3)
        bound = 1.0 / jnp.sqrt(jnp.array(fan_in, dtype=jnp.float32))
        w = jax.random.uniform(kw, (fan_in, fan_out), dtype=dtype,
                               minval=-bound, maxval=bound)
        b = jax.random.uniform(kb, (fan_out,), dtype=dtype,
                               minval=-bound, maxval=bound)
        params.append((w, b))
    return params


def ode_func_reference(t, x, params):
    """Plain-JAX reference for correctness checking."""
    del t
    h = x
    for i, (w, b) in enumerate(params):
        h = h @ w + b
        if i < len(params) - 1:
            h = jnp.tanh(h)
    return h


if __name__ == "__main__":
    # Small shapes consistent with ODEFunc(input_dim, hidden_dim, num_layers).
    batch = 8
    input_dim = 16
    hidden_dim = 32
    num_layers = 3

    key = jax.random.PRNGKey(0)
    key, kx = jax.random.split(key)
    x = jax.random.normal(kx, (batch, input_dim), dtype=jnp.float32)
    t = jnp.float32(0.0)  # unused by ODEFunc.forward

    params = init_ode_func_params(key, input_dim, hidden_dim, num_layers)

    fwd = jax.jit(ode_func_forward)  # fuses padding/slicing around the kernel

    out = jax.block_until_ready(fwd(t, x, params))
    ref = ode_func_reference(t, x, params)
    assert out.shape == (batch, input_dim)
    assert jnp.allclose(out, ref, atol=1e-5, rtol=1e-5), "mismatch vs reference"

    # Second check: many ODE states along the batch axis (exercises the
    # batch-tiled "parallel" grid and the row/feature padding path).
    xb = jax.random.normal(jax.random.PRNGKey(1), (300, input_dim),
                           dtype=jnp.float32)
    outb = jax.block_until_ready(fwd(t, xb, params))
    refb = ode_func_reference(t, xb, params)
    assert outb.shape == (300, input_dim)
    assert jnp.allclose(outb, refb, atol=1e-5, rtol=1e-5), "mismatch (batched)"

    print("KERNEL_OK")
</pallas_src>

<mosaic_0001>
module attributes {stable_mosaic.version = 11 : i64} {
  func.func @_mlp_kernel(%arg0: i32, %arg1: memref<8x128xf32, #tpu.memory_space<vmem>>, %arg2: memref<128x128xf32, #tpu.memory_space<vmem>>, %arg3: memref<1x128xf32, #tpu.memory_space<vmem>>, %arg4: memref<128x128xf32, #tpu.memory_space<vmem>>, %arg5: memref<1x128xf32, #tpu.memory_space<vmem>>, %arg6: memref<128x128xf32, #tpu.memory_space<vmem>>, %arg7: memref<1x128xf32, #tpu.memory_space<vmem>>, %arg8: memref<8x128xf32, #tpu.memory_space<vmem>>) attributes {dimension_semantics = [#tpu.dimension_semantics<parallel>], iteration_bounds = array<i64: 1>, scalar_prefetch = 0 : i64, scratch_operands = 0 : i64, tpu.core_type = #tpu.core_type<tc>, window_params = [{transform_indices = @transform_0, window_bounds = array<i64: 8, 128>}, {pipeline_mode = #tpu.pipeline_mode<synchronous>, transform_indices = @transform_1, window_bounds = array<i64: 128, 128>}, {pipeline_mode = #tpu.pipeline_mode<synchronous>, transform_indices = @transform_2, window_bounds = array<i64: 1, 128>}, {pipeline_mode = #tpu.pipeline_mode<synchronous>, transform_indices = @transform_3, window_bounds = array<i64: 128, 128>}, {pipeline_mode = #tpu.pipeline_mode<synchronous>, transform_indices = @transform_4, window_bounds = array<i64: 1, 128>}, {pipeline_mode = #tpu.pipeline_mode<synchronous>, transform_indices = @transform_5, window_bounds = array<i64: 128, 128>}, {pipeline_mode = #tpu.pipeline_mode<synchronous>, transform_indices = @transform_6, window_bounds = array<i64: 1, 128>}, {transform_indices = @transform_7, window_bounds = array<i64: 8, 128>}]} {
    %c0 = arith.constant 0 : index
    %c0_0 = arith.constant 0 : index
    %0 = vector.load %arg1[%c0, %c0_0] : memref<8x128xf32, #tpu.memory_space<vmem>>, vector<8x128xf32>
    %c0_1 = arith.constant 0 : index
    %c0_2 = arith.constant 0 : index
    %1 = vector.load %arg2[%c0_1, %c0_2] : memref<128x128xf32, #tpu.memory_space<vmem>>, vector<128x128xf32>
    %cst = arith.constant dense<0.000000e+00> : vector<8x128xf32>
    %2 = tpu.matmul %0, %1, %cst {dimension_numbers = #tpu.dot_dimension_numbers<[1], [0], [0], [1], [0, 0, 1, 1], [], []>} : vector<8x128xf32>, vector<128x128xf32>, vector<8x128xf32> -> vector<8x128xf32>
    %c0_3 = arith.constant 0 : index
    %c0_4 = arith.constant 0 : index
    %3 = vector.load %arg3[%c0_3, %c0_4] : memref<1x128xf32, #tpu.memory_space<vmem>>, vector<1x128xf32>
    %4 = vector.broadcast %3 : vector<1x128xf32> to vector<8x128xf32>
    %5 = arith.addf %2, %4 : vector<8x128xf32>
    %6 = math.tanh %5 : vector<8x128xf32>
    %c0_5 = arith.constant 0 : index
    %c0_6 = arith.constant 0 : index
    %7 = vector.load %arg4[%c0_5, %c0_6] : memref<128x128xf32, #tpu.memory_space<vmem>>, vector<128x128xf32>
    %cst_7 = arith.constant dense<0.000000e+00> : vector<8x128xf32>
    %8 = tpu.matmul %6, %7, %cst_7 {dimension_numbers = #tpu.dot_dimension_numbers<[1], [0], [0], [1], [0, 0, 1, 1], [], []>} : vector<8x128xf32>, vector<128x128xf32>, vector<8x128xf32> -> vector<8x128xf32>
    %c0_8 = arith.constant 0 : index
    %c0_9 = arith.constant 0 : index
    %9 = vector.load %arg5[%c0_8, %c0_9] : memref<1x128xf32, #tpu.memory_space<vmem>>, vector<1x128xf32>
    %10 = vector.broadcast %9 : vector<1x128xf32> to vector<8x128xf32>
    %11 = arith.addf %8, %10 : vector<8x128xf32>
    %12 = math.tanh %11 : vector<8x128xf32>
    %c0_10 = arith.constant 0 : index
    %c0_11 = arith.constant 0 : index
    %13 = vector.load %arg6[%c0_10, %c0_11] : memref<128x128xf32, #tpu.memory_space<vmem>>, vector<128x128xf32>
    %cst_12 = arith.constant dense<0.000000e+00> : vector<8x128xf32>
    %14 = tpu.matmul %12, %13, %cst_12 {dimension_numbers = #tpu.dot_dimension_numbers<[1], [0], [0], [1], [0, 0, 1, 1], [], []>} : vector<8x128xf32>, vector<128x128xf32>, vector<8x128xf32> -> vector<8x128xf32>
    %c0_13 = arith.constant 0 : index
    %c0_14 = arith.constant 0 : index
    %15 = vector.load %arg7[%c0_13, %c0_14] : memref<1x128xf32, #tpu.memory_space<vmem>>, vector<1x128xf32>
    %16 = vector.broadcast %15 : vector<1x128xf32> to vector<8x128xf32>
    %17 = arith.addf %14, %16 : vector<8x128xf32>
    %c0_15 = arith.constant 0 : index
    %c0_16 = arith.constant 0 : index
    %18 = vector.load %arg8[%c0_15, %c0_16] : memref<8x128xf32, #tpu.memory_space<vmem>>, vector<8x128xf32>
    tpu.vector_store %arg8[%c0_15, %c0_16], %17 {strides = array<i32>} : memref<8x128xf32, #tpu.memory_space<vmem>>, vector<8x128xf32>,
    return
  }
  func.func @transform_0(%arg0: i32) -> (i32, i32) {
    %c0_i32 = arith.constant 0 : i32
    %c0_i32_0 = arith.constant 0 : i32
    return %arg0, %c0_i32 : i32, i32
  }
  func.func @transform_1(%arg0: i32) -> (i32, i32) {
    %c0_i32 = arith.constant 0 : i32
    %c0_i32_0 = arith.constant 0 : i32
    %c0_i32_1 = arith.constant 0 : i32
    return %c0_i32, %c0_i32_0 : i32, i32
  }
  func.func @transform_2(%arg0: i32) -> (i32, i32) {
    %c0_i32 = arith.constant 0 : i32
    %c0_i32_0 = arith.constant 0 : i32
    %c0_i32_1 = arith.constant 0 : i32
    return %c0_i32, %c0_i32_0 : i32, i32
  }
  func.func @transform_3(%arg0: i32) -> (i32, i32) {
    %c0_i32 = arith.constant 0 : i32
    %c0_i32_0 = arith.constant 0 : i32
    %c0_i32_1 = arith.constant 0 : i32
    return %c0_i32, %c0_i32_0 : i32, i32
  }
  func.func @transform_4(%arg0: i32) -> (i32, i32) {
    %c0_i32 = arith.constant 0 : i32
    %c0_i32_0 = arith.constant 0 : i32
    %c0_i32_1 = arith.constant 0 : i32
    return %c0_i32, %c0_i32_0 : i32, i32
  }
  func.func @transform_5(%arg0: i32) -> (i32, i32) {
    %c0_i32 = arith.constant 0 : i32
    %c0_i32_0 = arith.constant 0 : i32
    %c0_i32_1 = arith.constant 0 : i32
    return %c0_i32, %c0_i32_0 : i32, i32
  }
  func.func @transform_6(%arg0: i32) -> (i32, i32) {
    %c0_i32 = arith.constant 0 : i32
    %c0_i32_0 = arith.constant 0 : i32
    %c0_i32_1 = arith.constant 0 : i32
    return %c0_i32, %c0_i32_0 : i32, i32
  }
  func.func @transform_7(%arg0: i32) -> (i32, i32) {
    %c0_i32 = arith.constant 0 : i32
    %c0_i32_0 = arith.constant 0 : i32
    return %arg0, %c0_i32 : i32, i32
  }
}

</mosaic_0001>

<bundles_post_ra>
// kernel: ode_func_forward.1
= control target key start
LH: loop header
LB: loop body
LE: loop exit
PB: predicated region body
PF: predicated region fallthrough
CT: control target
= control target key end

     0   :  { %v587_v3 = vmov 0.0|0.0   ;;  %vm588_vm0 = vmmov 0   ;;  %v589_v6 = vmov 0.0   ;;  %s829_s0 = inlined_call_operand.vmem [shape: f32[8,128], index: 0, kind: input, shape index: {}]   ;;  %s830_s1 = inlined_call_operand.vmem [shape: f32[128,128], index: 1, kind: input, shape index: {}]   ;;  %s831_s2 = inlined_call_operand.vmem [shape: f32[1,128], index: 2, kind: input, shape index: {}]   ;;  %s832_s3 = inlined_call_operand.vmem [shape: f32[128,128], index: 3, kind: input, shape index: {}]   ;;  %s833_s4 = inlined_call_operand.vmem [shape: f32[1,128], index: 4, kind: input, shape index: {}]   ;;  %s834_s5 = inlined_call_operand.vmem [shape: f32[128,128], index: 5, kind: input, shape index: {}]   ;;  %s835_s6 = inlined_call_operand.vmem [shape: f32[1,128], index: 6, kind: input, shape index: {}]   ;;  %s836_s7 = inlined_call_operand.hbm [shape: f32[8,128], index: 7, kind: output, shape index: {}]  }
   0x1   :  { %v28_v0 = vld [vmem:[%s830_s1] sm:$0xff]  ;;  %v29_v1 = vld [vmem:[%s830_s1 + $0x8] sm:$0xff]  ;;  %v30_v2 = vld [vmem:[%s830_s1 + $0x10] sm:$0xff]  ;;  %483 = vmatprep.subr.bf16.mxu0 %v587_v3  ;;  %410 = vmatprep.mubr.msk.f32.mxu0 %vm588_vm0, %v589_v6 }
   0x2   :  { %v484_v4 = vpack.c.bf16 %v29_v1, %v28_v0  ;;  %v31_v5 = vld [vmem:[%s830_s1 + $0x18] sm:$0xff]  ;;  %507 = vmatprep.subr.bf16.mxu1 %v587_v3  ;;  %445 = vmatprep.mubr.msk.f32.mxu1 %vm588_vm0, %v589_v6  ;;  %v32_v8 = vld [vmem:[%s830_s1 + $0x20] sm:$0xff]  ;;  %v33_v9 = vld [vmem:[%s830_s1 + $0x28] sm:$0xff] }
   0x3   :  { %v487_v7 = vpack.c.bf16 %v31_v5, %v30_v2  ;;  %v122_v10 = vld [vmem:[%s832_s3] sm:$0xff]  ;;  %v123_v11 = vld [vmem:[%s832_s3 + $0x8] sm:$0xff]  ;;  %v124_v12 = vld [vmem:[%s832_s3 + $0x10] sm:$0xff]  ;;  %v490_v14 = vpack.c.bf16 %v33_v9, %v32_v8 }
   0x4   :  { %485 = vmatpush3.bf16.msra.mxu0 %v484_v4  ;;  %v125_v13 = vld [vmem:[%s832_s3 + $0x18] sm:$0xff]  ;;  %v508_v15 = vpack.c.bf16 %v123_v11, %v122_v10  ;;  %v34_v16 = vld [vmem:[%s830_s1 + $0x30] sm:$0xff] }
   0x5   :  { %486 = vmatprep.subr.bf16.mxu0 %v587_v3  ;;  %v35_v17 = vld [vmem:[%s830_s1 + $0x38] sm:$0xff]  ;;  %v511_v18 = vpack.c.bf16 %v125_v13, %v124_v12 }
   0x6   :  { %509 = vmatpush3.bf16.msra.mxu1 %v508_v15 }
   0x8   :  { %488 = vmatpush3.bf16.msra.mxu0 %v487_v7 }
   0x9   :  { %489 = vmatprep.subr.bf16.mxu0 %v587_v3 }
   0xa   :  { %12 = vsyncpa [#allocation3], 0  ;;  %510 = vmatprep.subr.bf16.mxu1 %v587_v3  ;;  %v126_v19 = vld [vmem:[%s832_s3 + $0x20] sm:$0xff]  ;;  %v127_v20 = vld [vmem:[%s832_s3 + $0x28] sm:$0xff]  ;;  %v493_v21 = vpack.c.bf16 %v35_v17, %v34_v16 }
   0xb   :  { %v36_v22 = vld [vmem:[%s830_s1 + $0x40] sm:$0xff]  ;;  %v37_v23 = vld [vmem:[%s830_s1 + $0x48] sm:$0xff]  ;;  %512 = vmatpush3.bf16.msra.mxu1 %v511_v18  ;;  %v514_v24 = vpack.c.bf16 %v127_v20, %v126_v19  ;;  %v128_v25 = vld [vmem:[%s832_s3 + $0x30] sm:$0xff] }
   0xc   :  { %491 = vmatpush3.bf16.msra.mxu0 %v490_v14  ;;  %513 = vmatprep.subr.bf16.mxu1 %v587_v3  ;;  %v129_v26 = vld [vmem:[%s832_s3 + $0x38] sm:$0xff]  ;;  %v496_v27 = vpack.c.bf16 %v37_v23, %v36_v22  ;;  %v38_v28 = vld [vmem:[%s830_s1 + $0x50] sm:$0xff]  ;;  %v130_v31 = vld [vmem:[%s832_s3 + $0x40] sm:$0xff] }
   0xd   :  { %492 = vmatprep.subr.bf16.mxu0 %v587_v3  ;;  %v39_v29 = vld [vmem:[%s830_s1 + $0x58] sm:$0xff]  ;;  %v517_v30 = vpack.c.bf16 %v129_v26, %v128_v25  ;;  %v131_v32 = vld [vmem:[%s832_s3 + $0x48] sm:$0xff]  ;;  %v40_v34 = vld [vmem:[%s830_s1 + $0x60] sm:$0xff] }
   0xe   :  { %v499_v33 = vpack.c.bf16 %v39_v29, %v38_v28  ;;  %v41_v35 = vld [vmem:[%s830_s1 + $0x68] sm:$0xff]  ;;  %v520_v36 = vpack.c.bf16 %v131_v32, %v130_v31  ;;  %v42_v38 = vld [vmem:[%s830_s1 + $0x70] sm:$0xff]  ;;  %v43_v39 = vld [vmem:[%s830_s1 + $0x78] sm:$0xff] }
   0xf   :  { %515 = vmatpush3.bf16.msra.mxu1 %v514_v24  ;;  %v502_v37 = vpack.c.bf16 %v41_v35, %v40_v34  ;;  %v505_v40 = vpack.c.bf16 %v43_v39, %v42_v38  ;;  %v27_v41 = vld [vmem:[%s829_s0] sm:$0xff]  ;;  %v132_v42 = vld [vmem:[%s832_s3 + $0x50] sm:$0xff]  ;;  %v133_v43 = vld [vmem:[%s832_s3 + $0x58] sm:$0xff] }
  0x10   :  { %494 = vmatpush3.bf16.msra.mxu0 %v493_v21  ;;  %516 = vmatprep.subr.bf16.mxu1 %v587_v3  ;;  %v523_v44 = vpack.c.bf16 %v133_v43, %v132_v42  ;;  %v134_v45 = vld [vmem:[%s832_s3 + $0x60] sm:$0xff]  ;;  %v135_v46 = vld [vmem:[%s832_s3 + $0x68] sm:$0xff]  ;;  %v136_v48 = vld [vmem:[%s832_s3 + $0x70] sm:$0xff] }
  0x11   :  { %495 = vmatprep.subr.bf16.mxu0 %v587_v3  ;;  %v526_v47 = vpack.c.bf16 %v135_v46, %v134_v45  ;;  %v137_v49 = vld [vmem:[%s832_s3 + $0x78] sm:$0xff]  ;;  %v216_v51 = vld [vmem:[%s834_s5] sm:$0xff]  ;;  %v217_v52 = vld [vmem:[%s834_s5 + $0x8] sm:$0xff] }
  0x12   :  { %v529_v50 = vpack.c.bf16 %v137_v49, %v136_v48  ;;  %v218_v53 = vld [vmem:[%s834_s5 + $0x10] sm:$0xff]  ;;  %v532_v54 = vpack.c.bf16 %v217_v52, %v216_v51  ;;  %v219_v55 = vld [vmem:[%s834_s5 + $0x18] sm:$0xff]  ;;  %v220_v57 = vld [vmem:[%s834_s5 + $0x20] sm:$0xff] }
  0x13   :  { %518 = vmatpush3.bf16.msra.mxu1 %v517_v30  ;;  %v535_v56 = vpack.c.bf16 %v219_v55, %v218_v53  ;;  %v221_v58 = vld [vmem:[%s834_s5 + $0x28] sm:$0xff]  ;;  %v222_v60 = vld [vmem:[%s834_s5 + $0x30] sm:$0xff]  ;;  %v223_v61 = vld [vmem:[%s834_s5 + $0x38] sm:$0xff] }
  0x14   :  { %497 = vmatpush3.bf16.msra.mxu0 %v496_v27  ;;  %519 = vmatprep.subr.bf16.mxu1 %v587_v3  ;;  %v538_v59 = vpack.c.bf16 %v221_v58, %v220_v57  ;;  %v541_v62 = vpack.c.bf16 %v223_v61, %v222_v60  ;;  %v224_v63 = vld [vmem:[%s834_s5 + $0x40] sm:$0xff]  ;;  %v225_v0 = vld [vmem:[%s834_s5 + $0x48] sm:$0xff]  ;;  %v226_v8 = vld [vmem:[%s834_s5 + $0x50] sm:$0xff] }
  0x15   :  { %498 = vmatprep.subr.bf16.mxu0 %v587_v3  ;;  %v544_v1 = vpack.c.bf16 %v225_v0, %v224_v63  ;;  %v324_v2 = vld [vmem:[%s831_s2] ss:$0 sm:$0xff]  ;;  %v227_v9 = vld [vmem:[%s834_s5 + $0x58] sm:$0xff]  ;;  %v229_v12 = vld [vmem:[%s834_s5 + $0x68] sm:$0xff] }
  0x16   :  { %v547_v10 = vpack.c.bf16 %v227_v9, %v226_v8  ;;  %v228_v11 = vld [vmem:[%s834_s5 + $0x60] sm:$0xff]  ;;  %v230_v14 = vld [vmem:[%s834_s5 + $0x70] sm:$0xff]  ;;  %v231_v15 = vld [vmem:[%s834_s5 + $0x78] sm:$0xff]  ;;  %s590_s5 = smov [#allocation2]  }
  0x17   :  { %521 = vmatpush3.bf16.msra.mxu1 %v520_v36  ;;  %v550_v13 = vpack.c.bf16 %v229_v12, %v228_v11  ;;  %v553_v16 = vpack.c.bf16 %v231_v15, %v230_v14  ;;  %v325_v17 = vld [vmem:[%s833_s4] ss:$0 sm:$0xff]  ;;  %s316_s29 = sshll.u32 %s590_s5, 4  ;;  %s317_s29 = int_to_ptr.vmem [resolvable:$true] %s316_s29 }
  0x18   :  { %500 = vmatpush3.bf16.msra.mxu0 %v499_v33  ;;  %522 = vmatprep.subr.bf16.mxu1 %v587_v3  ;;  %v326_v22 = vld [vmem:[%s835_s6] ss:$0 sm:$0xff]  ;;  %s563_s30 = scalar_lea.vmem %s317_s29, 128  ;;  %p568_p1 = scmp.lt.s32.totalorder %s317_s29, %s317_s29 }
  0x19   :  { %501 = vmatprep.subr.bf16.mxu0 %v587_v3  ;;  %p564_p0 = scmp.ne.s32.totalorder %s317_s29, %s563_s30  ;;  %p569_p2 = scmp.lt.s32.totalorder %s563_s30, %s563_s30 }
  0x1b   :  { %524 = vmatpush3.bf16.msra.mxu1 %v523_v44  ;;  %p570_p3 = por %p569_p2, %p568_p1 }
  0x1c   :  { %503 = vmatpush3.bf16.msra.mxu0 %v502_v37  ;;  %525 = vmatprep.subr.bf16.mxu1 %v587_v3 }
  0x1d   :  { %504 = vmatprep.subr.bf16.mxu0 %v587_v3  ;;  %p571_p4 = pnand %p570_p3, %p564_p0 }
  0x1f   :  { %527 = vmatpush3.bf16.msra.mxu1 %v526_v47 }
  0x20   :  { %506 = vmatpush3.bf16.msra.mxu0 %v505_v40  ;;  %528 = vmatprep.subr.bf16.mxu1 %v587_v3 }
  0x21   :  { %531 = vmatprep.subr.bf16.mxu0 %v587_v3 }
  0x23   :  { %411 = vmatmul.mubr.f32.vlgmr.msra.gmra.mrb[0].mxu0 %v27_v41  ;;  %530 = vmatpush3.bf16.msra.mxu1 %v529_v50 }
  0x24   :  { %480 = vmatprep.mubr.msk.f32.mxu0 %vm588_vm0, %v589_v6  ;;  %533 = vmatpush3.bf16.msra.mxu0 %v532_v54 }
  0x25   :  { %534 = vmatprep.subr.bf16.mxu0 %v587_v3 }
  0x28   :  { %536 = vmatpush3.bf16.msra.mxu0 %v535_v56 }
  0x29   :  { %537 = vmatprep.subr.bf16.mxu0 %v587_v3 }
  0x2c   :  { %539 = vmatpush3.bf16.msra.mxu0 %v538_v59 }
  0x2d   :  { %540 = vmatprep.subr.bf16.mxu0 %v587_v3 }
  0x30   :  { %542 = vmatpush3.bf16.msra.mxu0 %v541_v62 }
  0x31   :  { %543 = vmatprep.subr.bf16.mxu0 %v587_v3 }
  0x34   :  { %545 = vmatpush3.bf16.msra.mxu0 %v544_v1 }
  0x35   :  { %546 = vmatprep.subr.bf16.mxu0 %v587_v3 }
  0x38   :  { %548 = vmatpush3.bf16.msra.mxu0 %v547_v10 }
  0x39   :  { %549 = vmatprep.subr.bf16.mxu0 %v587_v3 }
  0x3c   :  { %551 = vmatpush3.bf16.msra.mxu0 %v550_v13 }
  0x3d   :  { %552 = vmatprep.subr.bf16.mxu0 %v587_v3 }
  0x40   :  { %554 = vmatpush3.bf16.msra.mxu0 %v553_v16 }
  0xf6   :  { %v117_v4 = vpop.f32.mrb[0].mxu0 }
  0xf7   :  { %v118_v5 = vadd.f32 %v324_v2, %v117_v4  ;;  %v412_v6 = vpop.f32.mrb[1].mxu0 }
  0xf9   :  { %559 = vtanh.f32 %v118_v5 }
 0x103   :  { %v560_v7 = vpop.eup %559 }
 0x104   :  { %446 = vmatmul.mubr.f32.vlgmr.msra.gmra.mrb[0].mxu1 %v560_v7 }
 0x1d7   :  { %v211_v18 = vpop.f32.mrb[0].mxu1 }
 0x1d8   :  { %v212_v19 = vadd.f32 %v325_v17, %v211_v18  ;;  %v447_v20 = vpop.f32.mrb[1].mxu1 }
 0x1da   :  { %561 = vtanh.f32 %v212_v19 }
 0x1e4   :  { %v562_v21 = vpop.eup %561 }
 0x1e5   :  { %481 = vmatmul.mubr.f32.vlgmr.msra.gmra.mrb[2].mxu0 %v562_v21 }
 0x2b8   :  { %v305_v23 = vpop.f32.mrb[2].mxu0 }
 0x2b9   :  { %v306_v24 = vadd.f32 %v326_v22, %v305_v23  ;;  %v482_v3 = vpop.f32.mrb[3].mxu0 }
 0x2bb   :  { %309 = vst [vmem:[#allocation2] sm:$0xff] %v306_v24 }
 0x2bc   :  { %574 = shalt.err (!%p571_p4)
}
 0x2bd   :  { %s575_s9 = scalar_lea.hbm %s836_s7, 128 }
 0x2be   :  { %p576_p5 = scmp.ne.s32.totalorder %s836_s7, %s575_s9  ;;  %p579_p6 = scmp.lt.u32.totalorder %s575_s9, %s836_s7 }
 0x2c0   :  { %p581_p7 = pnand %p579_p6, %p576_p5 }
 0x2c2   :  { %584 = shalt.err (!%p581_p7)
}
 0x2c3   :  { %319 = dma.vmem_to_hbm [thread:$0]  %s317_s29, 128, %s836_s7, [#allocation3]  }
 0x2c4   :  { %585 = dma.done.wait [#allocation3], 128  }
 0x2c5   :  { %586 = vsyncadd [#allocation3], 4294967168 }
 0x2c6   :  { %323 = vsyncpa [#allocation3], 1 }

</bundles_post_ra>
